<compile_context>
chip_gen: v7x
topology: tpu7x:2x2x1
jax: 0.10.0
libtpu: 0.0.40
codegen_flags: <defaults>
</compile_context>

<pallas_src>
import jax
import jax.numpy as jnp
from jax.experimental import pallas as pl
from jax.experimental.pallas import tpu as pltpu


def _conv1x1_kernel(w_ref, x_ref, o_ref):
    # w_ref: [co_blk, c_in]      bf16 (pre-cast once at init time)
    # x_ref: [b_tile, c_in, hw]  input dtype; cast to bf16 in-kernel (free VPU work,
    #                            avoids a separate wrapper cast = extra HBM pass)
    # o_ref: [b_tile, co_blk, hw]
    w_bf = w_ref[...]
    for b in range(x_ref.shape[0]):  # b_tile is small & static -> unrolled 2D MXU matmuls
        o_ref[b, :, :] = jnp.dot(
            w_bf,
            x_ref[b, :, :].astype(jnp.bfloat16),
            preferred_element_type=jnp.float32,
        ).astype(o_ref.dtype)


def prepare_weight(weight_oihw: jax.Array) -> jax.Array:
    """One-time (init / param-load) prep: [C_out, C_in, 1, 1] f32 -> [C_out, C_in] bf16."""
    c_out, c_in = weight_oihw.shape[:2]
    return weight_oihw.reshape(c_out, c_in).astype(jnp.bfloat16)


def _pick_b_tile(n: int, cap: int = 8) -> int:
    # Largest divisor of n that is <= cap (keeps blocks exact; VMEM-safe on v7x's 64 MiB).
    for t in range(min(n, cap), 0, -1):
        if n % t == 0:
            return t
    return 1


def conv1x1_pallas(x_nchw: jax.Array, weight_oi_bf16: jax.Array,
                   *, out_dtype=jnp.float32) -> jax.Array:
    """1x1 conv, stride 1, no bias.

    x_nchw:         [N, C_in, H, W]
    weight_oi_bf16: [C_out, C_in] bf16 (from prepare_weight, cast once outside hot path)
    returns:        [N, C_out, H, W] in out_dtype (f32 by default, matching the module)
    """
    n, c_in, h, w = x_nchw.shape
    c_out, c_in_w = weight_oi_bf16.shape
    assert c_in == c_in_w, (c_in, c_in_w)
    hw = h * w

    # Free layout glue: NCHW already presents each image as [C_in, H*W].
    x_mat = x_nchw.reshape(n, c_in, hw)

    b_tile = _pick_b_tile(n)
    grid_b = n // b_tile

    # Split C_out across 2 blocks so both v7x TensorCores get work even at N=1.
    n_co = 2 if (c_out % 2 == 0 and (c_out // 2) % 8 == 0) else 1
    co_blk = c_out // n_co

    flops = 2 * n * c_out * c_in * hw
    bytes_accessed = (
        x_mat.size * x_mat.dtype.itemsize
        + weight_oi_bf16.size * weight_oi_bf16.dtype.itemsize
        + n * c_out * hw * jnp.dtype(out_dtype).itemsize
    )

    out = pl.pallas_call(
        _conv1x1_kernel,
        out_shape=jax.ShapeDtypeStruct((n, c_out, hw), out_dtype),
        grid=(grid_b, n_co),
        in_specs=[
            # Weight block: varies only with the (inner, size-2) C_out axis; tiny (~186 KB).
            pl.BlockSpec((co_blk, c_in), lambda b, c: (c, 0)),
            # B_TILE full images per grid step.
            pl.BlockSpec((b_tile, c_in, hw), lambda b, c: (b, 0, 0)),
        ],
        out_specs=pl.BlockSpec((b_tile, co_blk, hw), lambda b, c: (b, c, 0)),
        compiler_params=pltpu.CompilerParams(
            dimension_semantics=("parallel", "parallel"),
        ),
        cost_estimate=pl.CostEstimate(
            flops=flops, transcendentals=0, bytes_accessed=bytes_accessed,
        ),
    )(weight_oi_bf16, x_mat)

    return out.reshape(n, c_out, h, w)


if __name__ == "__main__":
    key = jax.random.PRNGKey(0)
    kx, kw = jax.random.split(key)

    # Shapes implied by the module's forward: x367 is [1, 176, 14, 14].
    x = jax.random.normal(kx, (1, 176, 14, 14), dtype=jnp.float32)
    # Synthetic weight for Conv2d(176, 1056, kernel_size=1, bias=False).
    weight = jax.random.normal(kw, (1056, 176, 1, 1), dtype=jnp.float32) * 0.05

    # One-time init-path cast (NOT part of the per-call hot path).
    w_bf16 = jax.block_until_ready(prepare_weight(weight))

    out = conv1x1_pallas(x, w_bf16)
    out = jax.block_until_ready(out)

    # Reference semantics of the PyTorch module (f32 conv). Tolerance relaxed
    # slightly because the kernel runs its operands in bf16 (f32 accumulate).
    ref = jax.lax.conv_general_dilated(
        x, weight, window_strides=(1, 1), padding="VALID",
        dimension_numbers=("NCHW", "OIHW", "NCHW"),
    )
    assert out.shape == (1, 1056, 14, 14), out.shape
    assert jnp.allclose(out, ref, atol=2e-2, rtol=2e-2)

    print("KERNEL_OK")
</pallas_src>

<mosaic_0001>
module attributes {stable_mosaic.version = 11 : i64} {
  func.func @_conv1x1_kernel(%arg0: i32, %arg1: i32, %arg2: memref<528x176xbf16, #tpu.memory_space<vmem>>, %arg3: memref<1x176x196xf32, #tpu.memory_space<vmem>>, %arg4: memref<1x528x196xf32, #tpu.memory_space<vmem>>) attributes {dimension_semantics = [#tpu.dimension_semantics<parallel>, #tpu.dimension_semantics<parallel>], iteration_bounds = array<i64: 1, 2>, scalar_prefetch = 0 : i64, scratch_operands = 0 : i64, tpu.core_type = #tpu.core_type<tc>, window_params = [{transform_indices = @transform_0, window_bounds = array<i64: 528, 176>}, {transform_indices = @transform_1, window_bounds = array<i64: 1, 176, 196>}, {transform_indices = @transform_2, window_bounds = array<i64: 1, 528, 196>}]} {
    %c0 = arith.constant 0 : index
    %c0_0 = arith.constant 0 : index
    %0 = vector.load %arg2[%c0, %c0_0] : memref<528x176xbf16, #tpu.memory_space<vmem>>, vector<528x176xbf16>
    %c0_1 = arith.constant 0 : index
    %c0_2 = arith.constant 0 : index
    %c0_3 = arith.constant 0 : index
    %1 = vector.load %arg3[%c0_1, %c0_2, %c0_3] : memref<1x176x196xf32, #tpu.memory_space<vmem>>, vector<1x176x196xf32>
    %2 = vector.shape_cast %1 : vector<1x176x196xf32> to vector<176x196xf32>
    %3 = arith.truncf %2 : vector<176x196xf32> to vector<176x196xbf16>
    %cst = arith.constant dense<0.000000e+00> : vector<528x196xf32>
    %4 = tpu.matmul %0, %3, %cst {dimension_numbers = #tpu.dot_dimension_numbers<[1], [0], [0], [1], [0, 0, 1, 1], [], []>} : vector<528x176xbf16>, vector<176x196xbf16>, vector<528x196xf32> -> vector<528x196xf32>
    %c0_4 = arith.constant 0 : index
    %c0_5 = arith.constant 0 : index
    %c0_6 = arith.constant 0 : index
    %5 = vector.load %arg4[%c0_4, %c0_5, %c0_6] : memref<1x528x196xf32, #tpu.memory_space<vmem>>, vector<1x528x196xf32>
    %6 = vector.shape_cast %5 : vector<1x528x196xf32> to vector<528x196xf32>
    %7 = vector.shape_cast %4 : vector<528x196xf32> to vector<1x528x196xf32>
    tpu.vector_store %arg4[%c0_4, %c0_5, %c0_6], %7 {strides = array<i32>} : memref<1x528x196xf32, #tpu.memory_space<vmem>>, vector<1x528x196xf32>,
    return
  }
  func.func @transform_0(%arg0: i32, %arg1: i32) -> (i32, i32) {
    %c0_i32 = arith.constant 0 : i32
    %c0_i32_0 = arith.constant 0 : i32
    return %arg1, %c0_i32 : i32, i32
  }
  func.func @transform_1(%arg0: i32, %arg1: i32) -> (i32, i32, i32) {
    %c0_i32 = arith.constant 0 : i32
    %c0_i32_0 = arith.constant 0 : i32
    %c0_i32_1 = arith.constant 0 : i32
    return %arg0, %c0_i32, %c0_i32_0 : i32, i32, i32
  }
  func.func @transform_2(%arg0: i32, %arg1: i32) -> (i32, i32, i32) {
    %c0_i32 = arith.constant 0 : i32
    %c0_i32_0 = arith.constant 0 : i32
    return %arg0, %arg1, %c0_i32 : i32, i32, i32
  }
}

</mosaic_0001>

<bundles_post_ra>
// kernel: tpu_custom_call.1
= control target key start
LH: loop header
LB: loop body
LE: loop exit
PB: predicated region body
PF: predicated region fallthrough
CT: control target
= control target key end

     0   :  { %7 = vsyncpa [#allocation3], 0  ;;  %s1670_s9 = smov 0   ;;  %s1672_s10 = smov 0   ;;  %s2056_s0 = inlined_call_operand.vmem [shape: bf16[1056,176], index: 0, kind: input, shape index: {}]   ;;  %s2057_s1 = inlined_call_operand.hbm [shape: f32[1,176,196], index: 1, kind: input, shape index: {}]   ;;  %s2058_s2 = inlined_call_operand.vmem [shape: f32[1,1056,196], index: 2, kind: output, shape index: {}]  }
   0x1   :  { %s1674_s11 = smov 0  }
   0x2 LB: > { %s1324_s12 = sadd.s32 4294967295, %s1650_s11   ;;  %s22_s13 = sadd.s32 1, %s1646_s10  ;;  %s1650_s11 = sphi %s1674_s11, %s13_s11   ;;  %s1646_s10 = sphi %s1672_s10, %s2069_s10   ;;  %s1642_s9 = sphi %s1670_s9, %s2068_s9  }
   0x3   : > { %p23_p0 = scmp.ge.s32.totalorder %s22_s13, 2  ;;  %p1326_p1 = scmp.ge.s32.totalorder %s1650_s11, 1 }
   0x4   : > { %p110_p2 = scmp.lt.s32.totalorder %s1650_s11, 3  ;;  %p1695_p4 = scmp.eq.s32.totalorder %s1324_s12, 0 }
   0x5   : > { %s2071_s13 = smov (%p23_p0, %s22_s13), 0  ;;  %s1652_s16 = smov [#allocation2]  }
   0x6   : > { %p1691_p3 = pnand %p1326_p1, %p110_p2  ;;  %s125_s17 = sshll.u32 %s1652_s16, 4  ;;  %s126_s17 = int_to_ptr.vmem [resolvable:$true] %s125_s17 }
   0x7   : > { %s2063_s15 = scalar_select %p1695_p4, 1, 0 }
   0x8   : > { %s2062_s14 = scalar_select %p1691_p3, 1, 0 }
   0x9   : > { %p1464_p5 = pneg %p1691_p3  ;;  %s1596_s21 = scalar_lea.hbm %s2057_s1, 5632 }
   0xa   : > { %p1597_p7 = scmp.ne.s32.totalorder %s2057_s1, %s1596_s21  ;;  %p1603_p11 = scmp.lt.u32.totalorder %s1596_s21, %s2057_s1 }
   0xb   : > { %p1703_p6 = pnand %p1695_p4, %p1464_p5 }
   0xd   : > { %p1598_p8 = pneg %p1703_p6 }
   0xf   : > { %p1599_p9 = pnand %p1598_p8, %p1597_p7 }
  0x11   : > { %p1600_p10 = pneg %p1599_p9 }
  0x13   : > { %p1605_p12 = pnand %p1603_p11, %p1600_p10 }
  0x15   : > { %1608 = shalt.err (!%p1605_p12)
}
  0x16   : > { %s1609_s26 = scalar_lea.vmem %s126_s17, 5632  ;;  %p1617_p2 = scmp.lt.s32.totalorder %s126_s17, %s126_s17 }
  0x17   : > { %p1610_p13 = scmp.ne.s32.totalorder %s126_s17, %s1609_s26  ;;  %p1618_p5 = scmp.lt.s32.totalorder %s1609_s26, %s1609_s26 }
  0x19   : > { %p1612_p0 = pnand %p1610_p13, %p1598_p8  ;;  %p1619_p4 = por %p1618_p5, %p1617_p2 }
  0x1b   : > { %p1613_p1 = pneg %p1612_p0 }
  0x1d   : > { %p1620_p3 = pnand %p1619_p4, %p1613_p1 }
  0x1f   : > { %1623 = shalt.err (!%p1620_p3)
}
  0x20   : > { %s1653_s27 = smov 256   ;;  %s1654_s28 = smov 16  }
  0x21   : > { %1467 = dma.hbm_to_vmem [thread:$0]  (!%p1703_p6), %s2057_s1, 5632, %s126_s17, [#allocation3], %s1653_s27, %s1653_s27, %s1654_s28  }
  0x22   : > { %p2065_p7 = scmp.ne.s32.totalorder %s2062_s14, 0 }
  0x23   : > { %p2066_p9 = scmp.ne.s32.totalorder (!%p2065_p7), %s2063_s15, 0 }
  0x24   : > { %151 = sbr.rel (%p2065_p7) target bundleno = 435 (0x1b3), region = 28 }
  0x2b   : > { %1637 = dma.done.wait (%p2066_p9), [#allocation3], 5632  }
  0x2c   : > { %1639 = vsyncadd (%p2066_p9), [#allocation3], 4294961664  ;;  %s179_s3 = smul.u32 66, %s1642_s9  ;;  %v265_v0 = vld [vmem:[#allocation2 + $0x8] sm:$0xff]  ;;  %v267_v1 = vld [vmem:[#allocation2 + $0x18] sm:$0xff]  ;;  %vm627_vm0 = vcmask 392192  }
  0x2d   : > { %v264_v2 = vld [vmem:[#allocation2] sm:$0xff]  ;;  %v309_v3 = vpack.c.bf16 %v267_v1, %v265_v0  ;;  %v266_v4 = vld [vmem:[#allocation2 + $0x10] sm:$0xff]  ;;  %v269_v5 = vld [vmem:[#allocation2 + $0x28] sm:$0xff]  ;;  %vm1091_vm1 = vcmask 556032  }
  0x2e   : > { %v271_v6 = vld [vmem:[#allocation2 + $0x38] sm:$0xff]  ;;  %p1730_p3 = scmp.lt.s32.totalorder %s179_s3, 131  ;;  %v308_v7 = vpack.c.bf16 %v266_v4, %v264_v2  ;;  %v268_v9 = vld [vmem:[#allocation2 + $0x20] sm:$0xff]  ;;  %v270_v10 = vld [vmem:[#allocation2 + $0x30] sm:$0xff] }
  0x2f   : > { %v311_v8 = vpack.c.bf16 %v271_v6, %v269_v5  ;;  %v273_v11 = vld [vmem:[#allocation2 + $0x48] sm:$0xff]  ;;  %727 = vmatprep.subr.bf16.mxu0 %v309_v3  ;;  %1438 = vmatprep.subr.bf16.mxu1 %v309_v3  ;;  %v275_v12 = vld [vmem:[#allocation2 + $0x58] sm:$0xff]  ;;  %v310_v13 = vpack.c.bf16 %v270_v10, %v268_v9  ;;  %v272_v15 = vld [vmem:[#allocation2 + $0x40] sm:$0xff] }
  0x30   : > { %728 = vmatpush1.bf16.msra.mxu0 %v308_v7  ;;  %1449 = vmatpush1.bf16.msra.mxu1 %v308_v7  ;;  %v313_v14 = vpack.c.bf16 %v275_v12, %v273_v11  ;;  %v274_v16 = vld [vmem:[#allocation2 + $0x50] sm:$0xff]  ;;  %s2073_s3 = smov (!%p1730_p3, %s179_s3), 131  ;;  %v277_v17 = vld [vmem:[#allocation2 + $0x68] sm:$0xff]  ;;  %v279_v18 = vld [vmem:[#allocation2 + $0x78] sm:$0xff] }
  0x31   : > { %729 = vmatprep.subr.bf16.mxu0 %v311_v8  ;;  %1439 = vmatprep.subr.bf16.mxu1 %v311_v8  ;;  %v312_v19 = vpack.c.bf16 %v274_v16, %v272_v15  ;;  %v315_v20 = vpack.c.bf16 %v279_v18, %v277_v17  ;;  %v276_v21 = vld [vmem:[#allocation2 + $0x60] sm:$0xff]  ;;  %v278_v22 = vld [vmem:[#allocation2 + $0x70] sm:$0xff]  ;;  %s1436_s5 = sshll.u32 %s2073_s3, 3  ;;  %v281_v23 = vld [vmem:[#allocation2 + $0x88] sm:$0xff]  ;;  %s1437_s9 = sshll.u32 %s2073_s3, 4 }
  0x32   : > { %v283_v24 = vld [vmem:[#allocation2 + $0x98] sm:$0xff]  ;;  %v314_v25 = vpack.c.bf16 %v278_v22, %v276_v21  ;;  %s1742_s8 = scalar_lea.vmem %s2056_s0, %s1436_s5  ;;  %v280_v27 = vld [vmem:[#allocation2 + $0x80] sm:$0xff]  ;;  %v282_v28 = vld [vmem:[#allocation2 + $0x90] sm:$0xff]  ;;  %s1847_s15 = scalar_lea.vmem %s2058_s2, %s1437_s9 }
  0x33   : > { %v317_v26 = vpack.c.bf16 %v283_v24, %v281_v23  ;;  %v285_v29 = vld [vmem:[#allocation2 + $0xa8] sm:$0xff]  ;;  %v287_v30 = vld [vmem:[#allocation2 + $0xb8] sm:$0xff]  ;;  %v284_v31 = vld [vmem:[#allocation2 + $0xa0] sm:$0xff]  ;;  %v316_v33 = vpack.c.bf16 %v282_v28, %v280_v27 }
  0x34   : > { %730 = vmatpush1.bf16.msra.mxu0 %v310_v13  ;;  %1450 = vmatpush1.bf16.msra.mxu1 %v310_v13  ;;  %v1499_v32 = vld [vmem:[%s1742_s8 + $0x4] ss:$8 sps:$4 sm:$0xff]   ;;  %v286_v34 = vld [vmem:[#allocation2 + $0xb0] sm:$0xff]  ;;  %v319_v35 = vpack.c.bf16 %v287_v30, %v285_v29  ;;  %v291_v38 = vld [vmem:[#allocation2 + $0xd8] sm:$0xff] }
  0x35   : > { %731 = vmatprep.subr.bf16.mxu0 %v313_v14  ;;  %1440 = vmatprep.subr.bf16.mxu1 %v313_v14  ;;  %v1502_v36 = vld [vmem:[%s1742_s8 + $0x114] ss:$8 sps:$4 sm:$0xff]   ;;  %v289_v37 = vld [vmem:[#allocation2 + $0xc8] sm:$0xff]  ;;  %v318_v39 = vpack.c.bf16 %v286_v34, %v284_v31  ;;  %v288_v40 = vld [vmem:[#allocation2 + $0xc0] sm:$0xff] }
  0x36   : > { %1401 = vmatprep.mubr.msk.bf16.mxu0 %vm627_vm0, %v1499_v32  ;;  %1418 = vmatprep.mubr.msk.bf16.mxu1 %vm627_vm0, %v1502_v36  ;;  %v321_v41 = vpack.c.bf16 %v291_v38, %v289_v37  ;;  %v290_v42 = vld [vmem:[#allocation2 + $0xd0] sm:$0xff]  ;;  %v293_v43 = vld [vmem:[#allocation2 + $0xe8] sm:$0xff]  ;;  %v295_v44 = vld [vmem:[#allocation2 + $0xf8] sm:$0xff] }
  0x37   : > { %v320_v45 = vpack.c.bf16 %v290_v42, %v288_v40  ;;  %v292_v46 = vld [vmem:[#allocation2 + $0xe0] sm:$0xff]  ;;  %v323_v47 = vpack.c.bf16 %v295_v44, %v293_v43  ;;  %v294_v48 = vld [vmem:[#allocation2 + $0xf0] sm:$0xff]  ;;  %v297_v49 = vld [vmem:[#allocation2 + $0x108] sm:$0xff] }
  0x38   : > { %732 = vmatpush1.bf16.msra.mxu0 %v312_v19  ;;  %1451 = vmatpush1.bf16.msra.mxu1 %v312_v19  ;;  %v299_v50 = vld [vmem:[#allocation2 + $0x118] sm:$0xff]  ;;  %v322_v51 = vpack.c.bf16 %v294_v48, %v292_v46  ;;  %v296_v52 = vld [vmem:[#allocation2 + $0x100] sm:$0xff]  ;;  %v298_v54 = vld [vmem:[#allocation2 + $0x110] sm:$0xff] }
  0x39   : > { %733 = vmatprep.subr.bf16.mxu0 %v315_v20  ;;  %1441 = vmatprep.subr.bf16.mxu1 %v315_v20  ;;  %v325_v53 = vpack.c.bf16 %v299_v50, %v297_v49  ;;  %v301_v55 = vld [vmem:[#allocation2 + $0x128] sm:$0xff]  ;;  %v303_v56 = vld [vmem:[#allocation2 + $0x138] sm:$0xff]  ;;  %v324_v57 = vpack.c.bf16 %v298_v54, %v296_v52  ;;  %v300_v58 = vld [vmem:[#allocation2 + $0x120] sm:$0xff] }
  0x3a   : > { %v327_v59 = vpack.c.bf16 %v303_v56, %v301_v55  ;;  %v302_v60 = vld [vmem:[#allocation2 + $0x130] sm:$0xff]  ;;  %v305_v61 = vld [vmem:[#allocation2 + $0x148] sm:$0xff]  ;;  %v307_v62 = vld [vmem:[#allocation2 + $0x158] sm:$0xff] }
  0x3b   : > { %v326_v63 = vpack.c.bf16 %v302_v60, %v300_v58  ;;  %v304_v0 = vld [vmem:[#allocation2 + $0x140] sm:$0xff]  ;;  %v329_v1 = vpack.c.bf16 %v307_v62, %v305_v61  ;;  %v306_v2 = vld [vmem:[#allocation2 + $0x150] sm:$0xff] }
  0x3c   : > { %734 = vmatpush1.bf16.msra.mxu0 %v314_v25  ;;  %1452 = vmatpush1.bf16.msra.mxu1 %v314_v25  ;;  %v328_v3 = vpack.c.bf16 %v306_v2, %v304_v0  ;;  %v1497_v4 = vld [vmem:[%s1742_s8] ss:$8 sps:$4 sm:$0xff]   ;;  %v1500_v5 = vld [vmem:[%s1742_s8 + $0x110] ss:$8 sps:$4 sm:$0xff]   ;;  %v1503_v6 = vld [vmem:[%s1742_s8 + $0x14] ss:$8 sps:$4 sm:$0xff]  }
  0x3d   : > { %735 = vmatprep.subr.bf16.mxu0 %v317_v26  ;;  %1442 = vmatprep.subr.bf16.mxu1 %v317_v26  ;;  %v1506_v7 = vld [vmem:[%s1742_s8 + $0x124] ss:$8 sps:$4 sm:$0xff]   ;;  %v1505_v8 = vld [vmem:[%s1742_s8 + $0x10] ss:$8 sps:$4 sm:$0xff]   ;;  %v1508_v9 = vld [vmem:[%s1742_s8 + $0x120] ss:$8 sps:$4 sm:$0xff]  }
  0x3e   : > { %v1509_v10 = vld [vmem:[%s1742_s8 + $0x24] ss:$8 sps:$4 sm:$0xff]   ;;  %v1512_v11 = vld [vmem:[%s1742_s8 + $0x134] ss:$8 sps:$4 sm:$0xff]   ;;  %v1511_v12 = vld [vmem:[%s1742_s8 + $0x20] ss:$8 sps:$4 sm:$0xff]  }
  0x3f   : > { %v1514_v13 = vld [vmem:[%s1742_s8 + $0x130] ss:$8 sps:$4 sm:$0xff]   ;;  %v1515_v14 = vld [vmem:[%s1742_s8 + $0x34] ss:$8 sps:$4 sm:$0xff]   ;;  %v1518_v15 = vld [vmem:[%s1742_s8 + $0x144] ss:$8 sps:$4 sm:$0xff]  }
  0x40   : > { %736 = vmatpush1.bf16.msra.mxu0 %v316_v33  ;;  %1453 = vmatpush1.bf16.msra.mxu1 %v316_v33  ;;  %v1517_v16 = vld [vmem:[%s1742_s8 + $0x30] ss:$8 sps:$4 sm:$0xff]   ;;  %v1520_v17 = vld [vmem:[%s1742_s8 + $0x140] ss:$8 sps:$4 sm:$0xff]   ;;  %v1521_v18 = vld [vmem:[%s1742_s8 + $0x44] ss:$8 sps:$4 sm:$0xff]  }
  0x41   : > { %737 = vmatprep.subr.bf16.mxu0 %v319_v35  ;;  %1443 = vmatprep.subr.bf16.mxu1 %v319_v35  ;;  %v1524_v19 = vld [vmem:[%s1742_s8 + $0x154] ss:$8 sps:$4 sm:$0xff]   ;;  %v1523_v20 = vld [vmem:[%s1742_s8 + $0x40] ss:$8 sps:$4 sm:$0xff]   ;;  %v1526_v21 = vld [vmem:[%s1742_s8 + $0x150] ss:$8 sps:$4 sm:$0xff]  }
  0x42   : > { %v1527_v22 = vld [vmem:[%s1742_s8 + $0x54] ss:$8 sps:$4 sm:$0xff]   ;;  %v1530_v23 = vld [vmem:[%s1742_s8 + $0x164] ss:$8 sps:$4 sm:$0xff]   ;;  %v1529_v24 = vld [vmem:[%s1742_s8 + $0x50] ss:$8 sps:$4 sm:$0xff]  }
  0x43   : > { %v1532_v25 = vld [vmem:[%s1742_s8 + $0x160] ss:$8 sps:$4 sm:$0xff]   ;;  %v1533_v26 = vld [vmem:[%s1742_s8 + $0x64] ss:$8 sps:$4 sm:$0xff]   ;;  %v1536_v27 = vld [vmem:[%s1742_s8 + $0x174] ss:$8 sps:$4 sm:$0xff]  }
  0x44   : > { %738 = vmatpush1.bf16.msra.mxu0 %v318_v39  ;;  %1454 = vmatpush1.bf16.msra.mxu1 %v318_v39  ;;  %v1535_v28 = vld [vmem:[%s1742_s8 + $0x60] ss:$8 sps:$4 sm:$0xff]   ;;  %v1538_v29 = vld [vmem:[%s1742_s8 + $0x170] ss:$8 sps:$4 sm:$0xff]   ;;  %v1539_v30 = vld [vmem:[%s1742_s8 + $0x74] ss:$8 sps:$4 sm:$0xff]  }
  0x45   : > { %739 = vmatprep.subr.bf16.mxu0 %v321_v41  ;;  %1444 = vmatprep.subr.bf16.mxu1 %v321_v41  ;;  %v1542_v31 = vld [vmem:[%s1742_s8 + $0x184] ss:$8 sps:$4 sm:$0xff]   ;;  %v1541_v32 = vld [vmem:[%s1742_s8 + $0x70] ss:$8 sps:$4 sm:$0xff]   ;;  %v1544_v33 = vld [vmem:[%s1742_s8 + $0x180] ss:$8 sps:$4 sm:$0xff]  }
  0x46   : > { %v1545_v34 = vld [vmem:[%s1742_s8 + $0x84] ss:$8 sps:$4 sm:$0xff]   ;;  %v1548_v35 = vld [vmem:[%s1742_s8 + $0x194] ss:$8 sps:$4 sm:$0xff]   ;;  %v1547_v36 = vld [vmem:[%s1742_s8 + $0x80] ss:$8 sps:$4 sm:$0xff]  }
  0x47   : > { %v1550_v37 = vld [vmem:[%s1742_s8 + $0x190] ss:$8 sps:$4 sm:$0xff]   ;;  %v1551_v38 = vld [vmem:[%s1742_s8 + $0x94] ss:$8 sps:$4 sm:$0xff]   ;;  %v1554_v39 = vld [vmem:[%s1742_s8 + $0x1a4] ss:$8 sps:$4 sm:$0xff]  }
  0x48   : > { %740 = vmatpush1.bf16.msra.mxu0 %v320_v45  ;;  %1455 = vmatpush1.bf16.msra.mxu1 %v320_v45  ;;  %v1553_v40 = vld [vmem:[%s1742_s8 + $0x90] ss:$8 sps:$4 sm:$0xff]   ;;  %v1556_v41 = vld [vmem:[%s1742_s8 + $0x1a0] ss:$8 sps:$4 sm:$0xff]   ;;  %v1557_v42 = vld [vmem:[%s1742_s8 + $0xa4] ss:$8 sps:$4 sm:$0xff]  }
  0x49   : > { %741 = vmatprep.subr.bf16.mxu0 %v323_v47  ;;  %1445 = vmatprep.subr.bf16.mxu1 %v323_v47  ;;  %v1560_v43 = vld [vmem:[%s1742_s8 + $0x1b4] ss:$8 sps:$4 sm:$0xff]   ;;  %v1559_v44 = vld [vmem:[%s1742_s8 + $0xa0] ss:$8 sps:$4 sm:$0xff]   ;;  %v1562_v45 = vld [vmem:[%s1742_s8 + $0x1b0] ss:$8 sps:$4 sm:$0xff]  }
  0x4a   : > { %v1563_v46 = vld [vmem:[%s1742_s8 + $0xb4] ss:$8 sps:$4 sm:$0xff]   ;;  %v1566_v47 = vld [vmem:[%s1742_s8 + $0x1c4] ss:$8 sps:$4 sm:$0xff]   ;;  %v1565_v48 = vld [vmem:[%s1742_s8 + $0xb0] ss:$8 sps:$4 sm:$0xff]  }
  0x4b   : > { %v1568_v49 = vld [vmem:[%s1742_s8 + $0x1c0] ss:$8 sps:$4 sm:$0xff]   ;;  %v1569_v50 = vld [vmem:[%s1742_s8 + $0xc4] ss:$8 sps:$4 sm:$0xff]   ;;  %v1575_v54 = vld [vmem:[%s1742_s8 + $0xd4] ss:$8 sps:$4 sm:$0xff]  }
  0x4c   : > { %742 = vmatpush1.bf16.msra.mxu0 %v322_v51  ;;  %1456 = vmatpush1.bf16.msra.mxu1 %v322_v51  ;;  %v1572_v51 = vld [vmem:[%s1742_s8 + $0x1d4] ss:$8 sps:$4 sm:$0xff]   ;;  %v1571_v52 = vld [vmem:[%s1742_s8 + $0xc0] ss:$8 sps:$4 sm:$0xff]   ;;  %v1578_v55 = vld [vmem:[%s1742_s8 + $0x1e4] ss:$8 sps:$4 sm:$0xff]  }
  0x4d   : > { %743 = vmatprep.subr.bf16.mxu0 %v325_v53  ;;  %1446 = vmatprep.subr.bf16.mxu1 %v325_v53  ;;  %v1574_v53 = vld [vmem:[%s1742_s8 + $0x1d0] ss:$8 sps:$4 sm:$0xff]   ;;  %v1581_v58 = vld [vmem:[%s1742_s8 + $0xe4] ss:$8 sps:$4 sm:$0xff]   ;;  %v1583_v60 = vld [vmem:[%s1742_s8 + $0xe0] ss:$8 sps:$4 sm:$0xff]  }
  0x4e   : > { %v1577_v56 = vld [vmem:[%s1742_s8 + $0xd0] ss:$8 sps:$4 sm:$0xff]   ;;  %v1587_v62 = vld [vmem:[%s1742_s8 + $0xf4] ss:$8 sps:$4 sm:$0xff]   ;;  %v1593_v2 = vld [vmem:[%s1742_s8 + $0x104] ss:$8 sps:$4 sm:$0xff]  }
  0x4f   : > { %v1586_v61 = vld [vmem:[%s1742_s8 + $0x1f0] ss:$8 sps:$4 sm:$0xff]  }
  0x50   : > { %744 = vmatpush1.bf16.msra.mxu0 %v324_v57  ;;  %1457 = vmatpush1.bf16.msra.mxu1 %v324_v57  ;;  %v1580_v57 = vld [vmem:[%s1742_s8 + $0x1e0] ss:$8 sps:$4 sm:$0xff]   ;;  %v1589_v0 = vld [vmem:[%s1742_s8 + $0xf0] ss:$8 sps:$4 sm:$0xff]  }
  0x51   : > { %745 = vmatprep.subr.bf16.mxu0 %v327_v59  ;;  %1447 = vmatprep.subr.bf16.mxu1 %v327_v59  ;;  %v1584_v59 = vld [vmem:[%s1742_s8 + $0x1f4] ss:$8 sps:$4 sm:$0xff]  }
  0x54   : > { %746 = vmatpush1.bf16.msra.mxu0 %v326_v63  ;;  %1458 = vmatpush1.bf16.msra.mxu1 %v326_v63  ;;  %v1590_v63 = vld [vmem:[%s1742_s8 + $0x204] ss:$8 sps:$4 sm:$0xff]  }
  0x55   : > { %747 = vmatprep.subr.bf16.mxu0 %v329_v1  ;;  %1448 = vmatprep.subr.bf16.mxu1 %v329_v1  ;;  %v1592_v1 = vld [vmem:[%s1742_s8 + $0x200] ss:$8 sps:$4 sm:$0xff]  }
  0x58   : > { %748 = vmatpush1.bf16.msra.mxu0 %v328_v3  ;;  %1459 = vmatpush1.bf16.msra.mxu1 %v328_v3  ;;  %v1595_v3 = vld [vmem:[%s1742_s8 + $0x100] ss:$8 sps:$4 sm:$0xff]  }
  0x5b   : > { %760 = vmatmul.mubr.bf16.vlgmr.msra.gmra.mrb[0].mxu0 %v1497_v4  ;;  %930 = vmatmul.mubr.bf16.vlgmr.msra.gmra.mrb[0].mxu1 %v1500_v5 }
  0x5c   : > { %1402 = vmatprep.mubr.msk.bf16.mxu0 %vm627_vm0, %v1503_v6  ;;  %1419 = vmatprep.mubr.msk.bf16.mxu1 %vm627_vm0, %v1506_v7 }
  0x63   : > { %770 = vmatmul.mubr.bf16.gmra.mrb[4].mxu0 %v1505_v8  ;;  %940 = vmatmul.mubr.bf16.gmra.mrb[4].mxu1 %v1508_v9 }
  0x64   : > { %1403 = vmatprep.mubr.msk.bf16.mxu0 %vm627_vm0, %v1509_v10  ;;  %1420 = vmatprep.mubr.msk.bf16.mxu1 %vm627_vm0, %v1512_v11 }
  0x6b   : > { %780 = vmatmul.mubr.bf16.gmra.mrb[8].mxu0 %v1511_v12  ;;  %950 = vmatmul.mubr.bf16.gmra.mrb[8].mxu1 %v1514_v13 }
  0x6c   : > { %1404 = vmatprep.mubr.msk.bf16.mxu0 %vm627_vm0, %v1515_v14  ;;  %1421 = vmatprep.mubr.msk.bf16.mxu1 %vm627_vm0, %v1518_v15 }
  0x73   : > { %790 = vmatmul.mubr.bf16.gmra.mrb[12].mxu0 %v1517_v16  ;;  %960 = vmatmul.mubr.bf16.gmra.mrb[12].mxu1 %v1520_v17 }
  0x74   : > { %1405 = vmatprep.mubr.msk.bf16.mxu0 %vm627_vm0, %v1521_v18  ;;  %1422 = vmatprep.mubr.msk.bf16.mxu1 %vm627_vm0, %v1524_v19 }
  0x7b   : > { %800 = vmatmul.mubr.bf16.gmra.mrb[16].mxu0 %v1523_v20  ;;  %970 = vmatmul.mubr.bf16.gmra.mrb[16].mxu1 %v1526_v21 }
  0x7c   : > { %1406 = vmatprep.mubr.msk.bf16.mxu0 %vm627_vm0, %v1527_v22  ;;  %1423 = vmatprep.mubr.msk.bf16.mxu1 %vm627_vm0, %v1530_v23 }
  0x83   : > { %810 = vmatmul.mubr.bf16.gmra.mrb[20].mxu0 %v1529_v24  ;;  %980 = vmatmul.mubr.bf16.gmra.mrb[20].mxu1 %v1532_v25 }
  0x84   : > { %1407 = vmatprep.mubr.msk.bf16.mxu0 %vm627_vm0, %v1533_v26  ;;  %1424 = vmatprep.mubr.msk.bf16.mxu1 %vm627_vm0, %v1536_v27 }
  0x8b   : > { %820 = vmatmul.mubr.bf16.gmra.mrb[24].mxu0 %v1535_v28  ;;  %990 = vmatmul.mubr.bf16.gmra.mrb[24].mxu1 %v1538_v29 }
  0x8c   : > { %1408 = vmatprep.mubr.msk.bf16.mxu0 %vm627_vm0, %v1539_v30  ;;  %1425 = vmatprep.mubr.msk.bf16.mxu1 %vm627_vm0, %v1542_v31 }
  0x93   : > { %830 = vmatmul.mubr.bf16.gmra.mrb[28].mxu0 %v1541_v32  ;;  %1000 = vmatmul.mubr.bf16.gmra.mrb[28].mxu1 %v1544_v33 }
  0x94   : > { %1409 = vmatprep.mubr.msk.bf16.mxu0 %vm627_vm0, %v1545_v34  ;;  %1426 = vmatprep.mubr.msk.bf16.mxu1 %vm627_vm0, %v1548_v35 }
  0x9b   : > { %840 = vmatmul.mubr.bf16.gmra.mrb[32].mxu0 %v1547_v36  ;;  %1010 = vmatmul.mubr.bf16.gmra.mrb[32].mxu1 %v1550_v37 }
  0x9c   : > { %1410 = vmatprep.mubr.msk.bf16.mxu0 %vm627_vm0, %v1551_v38  ;;  %1427 = vmatprep.mubr.msk.bf16.mxu1 %vm627_vm0, %v1554_v39 }
  0xa3   : > { %850 = vmatmul.mubr.bf16.gmra.mrb[36].mxu0 %v1553_v40  ;;  %1020 = vmatmul.mubr.bf16.gmra.mrb[36].mxu1 %v1556_v41 }
  0xa4   : > { %1411 = vmatprep.mubr.msk.bf16.mxu0 %vm627_vm0, %v1557_v42  ;;  %1428 = vmatprep.mubr.msk.bf16.mxu1 %vm627_vm0, %v1560_v43 }
  0xab   : > { %860 = vmatmul.mubr.bf16.gmra.mrb[40].mxu0 %v1559_v44  ;;  %1030 = vmatmul.mubr.bf16.gmra.mrb[40].mxu1 %v1562_v45 }
  0xac   : > { %1412 = vmatprep.mubr.msk.bf16.mxu0 %vm627_vm0, %v1563_v46  ;;  %1429 = vmatprep.mubr.msk.bf16.mxu1 %vm627_vm0, %v1566_v47 }
  0xb3   : > { %870 = vmatmul.mubr.bf16.gmra.mrb[44].mxu0 %v1565_v48  ;;  %1040 = vmatmul.mubr.bf16.gmra.mrb[44].mxu1 %v1568_v49 }
  0xb4   : > { %1413 = vmatprep.mubr.msk.bf16.mxu0 %vm627_vm0, %v1569_v50  ;;  %1430 = vmatprep.mubr.msk.bf16.mxu1 %vm627_vm0, %v1572_v51 }
  0xbb   : > { %880 = vmatmul.mubr.bf16.gmra.mrb[48].mxu0 %v1571_v52  ;;  %1050 = vmatmul.mubr.bf16.gmra.mrb[48].mxu1 %v1574_v53 }
  0xbc   : > { %1414 = vmatprep.mubr.msk.bf16.mxu0 %vm627_vm0, %v1575_v54  ;;  %1431 = vmatprep.mubr.msk.bf16.mxu1 %vm627_vm0, %v1578_v55 }
  0xc3   : > { %890 = vmatmul.mubr.bf16.gmra.mrb[52].mxu0 %v1577_v56  ;;  %1060 = vmatmul.mubr.bf16.gmra.mrb[52].mxu1 %v1580_v57 }
  0xc4   : > { %1415 = vmatprep.mubr.msk.bf16.mxu0 %vm627_vm0, %v1581_v58  ;;  %1432 = vmatprep.mubr.msk.bf16.mxu1 %vm627_vm0, %v1584_v59 }
  0xcb   : > { %900 = vmatmul.mubr.bf16.gmra.mrb[56].mxu0 %v1583_v60  ;;  %1070 = vmatmul.mubr.bf16.gmra.mrb[56].mxu1 %v1586_v61 }
  0xcc   : > { %1416 = vmatprep.mubr.msk.bf16.mxu0 %vm627_vm0, %v1587_v62  ;;  %1433 = vmatprep.mubr.msk.bf16.mxu1 %vm627_vm0, %v1590_v63 }
  0xd3   : > { %910 = vmatmul.mubr.bf16.gmra.mrb[60].mxu0 %v1589_v0  ;;  %1080 = vmatmul.mubr.bf16.gmra.mrb[60].mxu1 %v1592_v1 }
  0xd4   : > { %1417 = vmatprep.mubr.msk.bf16.mxu0 %vm627_vm0, %v1593_v2 }
  0xdb   : > { %920 = vmatmul.mubr.bf16.gmra.mrb[64].mxu0 %v1595_v3 }
 0x12e   : > { %v761_v4 = vpop.f32.mrb[0].mxu0  ;;  %v931_v5 = vpop.f32.mrb[0].mxu1 }
 0x12f   : > { %1090 = vst [vmem:[%s1847_s15] sm:$0xff] %v761_v4  ;;  %v763_v6 = vpop.f32.mrb[1].mxu0  ;;  %1159 = vst [vmem:[%s1847_s15 + $0x220] sm:$0xff] %v931_v5  ;;  %v933_v7 = vpop.f32.mrb[1].mxu1 }
 0x130   : > { %1092 = vst.msk [vmem:[%s1847_s15 + $0x8] sm:$0xff] %vm1091_vm1, %v763_v6  ;;  %v765_v8 = vpop.f32.mrb[2].mxu0  ;;  %1160 = vst.msk [vmem:[%s1847_s15 + $0x228] sm:$0xff] %vm1091_vm1, %v933_v7  ;;  %v935_v9 = vpop.f32.mrb[2].mxu1 }
 0x131   : > { %1093 = vst [vmem:[%s1847_s15 + $0x10] sm:$0xff] %v765_v8  ;;  %v767_v10 = vpop.f32.mrb[3].mxu0  ;;  %1161 = vst [vmem:[%s1847_s15 + $0x230] sm:$0xff] %v935_v9  ;;  %v937_v11 = vpop.f32.mrb[3].mxu1 }
 0x132   : > { %1094 = vst.msk [vmem:[%s1847_s15 + $0x18] sm:$0xff] %vm1091_vm1, %v767_v10  ;;  %1162 = vst.msk [vmem:[%s1847_s15 + $0x238] sm:$0xff] %vm1091_vm1, %v937_v11 }
 0x136   : > { %v771_v12 = vpop.f32.mrb[4].mxu0  ;;  %v941_v13 = vpop.f32.mrb[4].mxu1 }
 0x137   : > { %1095 = vst [vmem:[%s1847_s15 + $0x20] sm:$0xff] %v771_v12  ;;  %v773_v14 = vpop.f32.mrb[5].mxu0  ;;  %1163 = vst [vmem:[%s1847_s15 + $0x240] sm:$0xff] %v941_v13  ;;  %v943_v15 = vpop.f32.mrb[5].mxu1 }
 0x138   : > { %1096 = vst.msk [vmem:[%s1847_s15 + $0x28] sm:$0xff] %vm1091_vm1, %v773_v14  ;;  %v775_v16 = vpop.f32.mrb[6].mxu0  ;;  %1164 = vst.msk [vmem:[%s1847_s15 + $0x248] sm:$0xff] %vm1091_vm1, %v943_v15  ;;  %v945_v17 = vpop.f32.mrb[6].mxu1 }
 0x139   : > { %1097 = vst [vmem:[%s1847_s15 + $0x30] sm:$0xff] %v775_v16  ;;  %v777_v18 = vpop.f32.mrb[7].mxu0  ;;  %1165 = vst [vmem:[%s1847_s15 + $0x250] sm:$0xff] %v945_v17  ;;  %v947_v19 = vpop.f32.mrb[7].mxu1 }
 0x13a   : > { %1098 = vst.msk [vmem:[%s1847_s15 + $0x38] sm:$0xff] %vm1091_vm1, %v777_v18  ;;  %1166 = vst.msk [vmem:[%s1847_s15 + $0x258] sm:$0xff] %vm1091_vm1, %v947_v19 }
 0x13e   : > { %v781_v20 = vpop.f32.mrb[8].mxu0  ;;  %v951_v21 = vpop.f32.mrb[8].mxu1 }
 0x13f   : > { %1099 = vst [vmem:[%s1847_s15 + $0x40] sm:$0xff] %v781_v20  ;;  %v783_v22 = vpop.f32.mrb[9].mxu0  ;;  %1167 = vst [vmem:[%s1847_s15 + $0x260] sm:$0xff] %v951_v21  ;;  %v953_v23 = vpop.f32.mrb[9].mxu1 }
 0x140   : > { %1100 = vst.msk [vmem:[%s1847_s15 + $0x48] sm:$0xff] %vm1091_vm1, %v783_v22  ;;  %v785_v24 = vpop.f32.mrb[10].mxu0  ;;  %1168 = vst.msk [vmem:[%s1847_s15 + $0x268] sm:$0xff] %vm1091_vm1, %v953_v23  ;;  %v955_v25 = vpop.f32.mrb[10].mxu1 }
 0x141   : > { %1101 = vst [vmem:[%s1847_s15 + $0x50] sm:$0xff] %v785_v24  ;;  %v787_v26 = vpop.f32.mrb[11].mxu0  ;;  %1169 = vst [vmem:[%s1847_s15 + $0x270] sm:$0xff] %v955_v25  ;;  %v957_v27 = vpop.f32.mrb[11].mxu1 }
 0x142   : > { %1102 = vst.msk [vmem:[%s1847_s15 + $0x58] sm:$0xff] %vm1091_vm1, %v787_v26  ;;  %1170 = vst.msk [vmem:[%s1847_s15 + $0x278] sm:$0xff] %vm1091_vm1, %v957_v27 }
 0x146   : > { %v791_v28 = vpop.f32.mrb[12].mxu0  ;;  %v961_v29 = vpop.f32.mrb[12].mxu1 }
 0x147   : > { %1103 = vst [vmem:[%s1847_s15 + $0x60] sm:$0xff] %v791_v28  ;;  %v793_v30 = vpop.f32.mrb[13].mxu0  ;;  %1171 = vst [vmem:[%s1847_s15 + $0x280] sm:$0xff] %v961_v29  ;;  %v963_v31 = vpop.f32.mrb[13].mxu1 }
 0x148   : > { %1104 = vst.msk [vmem:[%s1847_s15 + $0x68] sm:$0xff] %vm1091_vm1, %v793_v30  ;;  %v795_v32 = vpop.f32.mrb[14].mxu0  ;;  %1172 = vst.msk [vmem:[%s1847_s15 + $0x288] sm:$0xff] %vm1091_vm1, %v963_v31  ;;  %v965_v33 = vpop.f32.mrb[14].mxu1 }
 0x149   : > { %1105 = vst [vmem:[%s1847_s15 + $0x70] sm:$0xff] %v795_v32  ;;  %v797_v34 = vpop.f32.mrb[15].mxu0  ;;  %1173 = vst [vmem:[%s1847_s15 + $0x290] sm:$0xff] %v965_v33  ;;  %v967_v35 = vpop.f32.mrb[15].mxu1 }
 0x14a   : > { %1106 = vst.msk [vmem:[%s1847_s15 + $0x78] sm:$0xff] %vm1091_vm1, %v797_v34  ;;  %1174 = vst.msk [vmem:[%s1847_s15 + $0x298] sm:$0xff] %vm1091_vm1, %v967_v35 }
 0x14e   : > { %v801_v36 = vpop.f32.mrb[16].mxu0  ;;  %v971_v37 = vpop.f32.mrb[16].mxu1 }
 0x14f   : > { %1107 = vst [vmem:[%s1847_s15 + $0x80] sm:$0xff] %v801_v36  ;;  %v803_v38 = vpop.f32.mrb[17].mxu0  ;;  %1175 = vst [vmem:[%s1847_s15 + $0x2a0] sm:$0xff] %v971_v37  ;;  %v973_v39 = vpop.f32.mrb[17].mxu1 }
 0x150   : > { %1108 = vst.msk [vmem:[%s1847_s15 + $0x88] sm:$0xff] %vm1091_vm1, %v803_v38  ;;  %v805_v40 = vpop.f32.mrb[18].mxu0  ;;  %1176 = vst.msk [vmem:[%s1847_s15 + $0x2a8] sm:$0xff] %vm1091_vm1, %v973_v39  ;;  %v975_v41 = vpop.f32.mrb[18].mxu1 }
 0x151   : > { %1109 = vst [vmem:[%s1847_s15 + $0x90] sm:$0xff] %v805_v40  ;;  %v807_v42 = vpop.f32.mrb[19].mxu0  ;;  %1177 = vst [vmem:[%s1847_s15 + $0x2b0] sm:$0xff] %v975_v41  ;;  %v977_v43 = vpop.f32.mrb[19].mxu1 }
 0x152   : > { %1110 = vst.msk [vmem:[%s1847_s15 + $0x98] sm:$0xff] %vm1091_vm1, %v807_v42  ;;  %1178 = vst.msk [vmem:[%s1847_s15 + $0x2b8] sm:$0xff] %vm1091_vm1, %v977_v43 }
 0x156   : > { %v811_v44 = vpop.f32.mrb[20].mxu0  ;;  %v981_v45 = vpop.f32.mrb[20].mxu1 }
 0x157   : > { %1111 = vst [vmem:[%s1847_s15 + $0xa0] sm:$0xff] %v811_v44  ;;  %v813_v46 = vpop.f32.mrb[21].mxu0  ;;  %1179 = vst [vmem:[%s1847_s15 + $0x2c0] sm:$0xff] %v981_v45  ;;  %v983_v47 = vpop.f32.mrb[21].mxu1 }
 0x158   : > { %1112 = vst.msk [vmem:[%s1847_s15 + $0xa8] sm:$0xff] %vm1091_vm1, %v813_v46  ;;  %v815_v48 = vpop.f32.mrb[22].mxu0  ;;  %1180 = vst.msk [vmem:[%s1847_s15 + $0x2c8] sm:$0xff] %vm1091_vm1, %v983_v47  ;;  %v985_v49 = vpop.f32.mrb[22].mxu1 }
 0x159   : > { %1113 = vst [vmem:[%s1847_s15 + $0xb0] sm:$0xff] %v815_v48  ;;  %v817_v50 = vpop.f32.mrb[23].mxu0  ;;  %1181 = vst [vmem:[%s1847_s15 + $0x2d0] sm:$0xff] %v985_v49  ;;  %v987_v51 = vpop.f32.mrb[23].mxu1 }
 0x15a   : > { %1114 = vst.msk [vmem:[%s1847_s15 + $0xb8] sm:$0xff] %vm1091_vm1, %v817_v50  ;;  %1182 = vst.msk [vmem:[%s1847_s15 + $0x2d8] sm:$0xff] %vm1091_vm1, %v987_v51 }
 0x15e   : > { %v821_v52 = vpop.f32.mrb[24].mxu0  ;;  %v991_v53 = vpop.f32.mrb[24].mxu1 }
 0x15f   : > { %1115 = vst [vmem:[%s1847_s15 + $0xc0] sm:$0xff] %v821_v52  ;;  %v823_v54 = vpop.f32.mrb[25].mxu0  ;;  %1183 = vst [vmem:[%s1847_s15 + $0x2e0] sm:$0xff] %v991_v53  ;;  %v993_v55 = vpop.f32.mrb[25].mxu1 }
 0x160   : > { %1116 = vst.msk [vmem:[%s1847_s15 + $0xc8] sm:$0xff] %vm1091_vm1, %v823_v54  ;;  %v825_v56 = vpop.f32.mrb[26].mxu0  ;;  %1184 = vst.msk [vmem:[%s1847_s15 + $0x2e8] sm:$0xff] %vm1091_vm1, %v993_v55  ;;  %v995_v57 = vpop.f32.mrb[26].mxu1 }
 0x161   : > { %1117 = vst [vmem:[%s1847_s15 + $0xd0] sm:$0xff] %v825_v56  ;;  %v827_v58 = vpop.f32.mrb[27].mxu0  ;;  %1185 = vst [vmem:[%s1847_s15 + $0x2f0] sm:$0xff] %v995_v57  ;;  %v997_v59 = vpop.f32.mrb[27].mxu1 }
 0x162   : > { %1118 = vst.msk [vmem:[%s1847_s15 + $0xd8] sm:$0xff] %vm1091_vm1, %v827_v58  ;;  %1186 = vst.msk [vmem:[%s1847_s15 + $0x2f8] sm:$0xff] %vm1091_vm1, %v997_v59 }
 0x166   : > { %v831_v60 = vpop.f32.mrb[28].mxu0  ;;  %v1001_v61 = vpop.f32.mrb[28].mxu1 }
 0x167   : > { %1119 = vst [vmem:[%s1847_s15 + $0xe0] sm:$0xff] %v831_v60  ;;  %v833_v62 = vpop.f32.mrb[29].mxu0  ;;  %1187 = vst [vmem:[%s1847_s15 + $0x300] sm:$0xff] %v1001_v61  ;;  %v1003_v63 = vpop.f32.mrb[29].mxu1 }
 0x168   : > { %1120 = vst.msk [vmem:[%s1847_s15 + $0xe8] sm:$0xff] %vm1091_vm1, %v833_v62  ;;  %v835_v0 = vpop.f32.mrb[30].mxu0  ;;  %1188 = vst.msk [vmem:[%s1847_s15 + $0x308] sm:$0xff] %vm1091_vm1, %v1003_v63  ;;  %v1005_v1 = vpop.f32.mrb[30].mxu1 }
 0x169   : > { %1121 = vst [vmem:[%s1847_s15 + $0xf0] sm:$0xff] %v835_v0  ;;  %v837_v2 = vpop.f32.mrb[31].mxu0  ;;  %1189 = vst [vmem:[%s1847_s15 + $0x310] sm:$0xff] %v1005_v1  ;;  %v1007_v3 = vpop.f32.mrb[31].mxu1 }
 0x16a   : > { %1122 = vst.msk [vmem:[%s1847_s15 + $0xf8] sm:$0xff] %vm1091_vm1, %v837_v2  ;;  %1190 = vst.msk [vmem:[%s1847_s15 + $0x318] sm:$0xff] %vm1091_vm1, %v1007_v3 }
 0x16e   : > { %v841_v4 = vpop.f32.mrb[32].mxu0  ;;  %v1011_v5 = vpop.f32.mrb[32].mxu1 }
 0x16f   : > { %1123 = vst [vmem:[%s1847_s15 + $0x100] sm:$0xff] %v841_v4  ;;  %v843_v6 = vpop.f32.mrb[33].mxu0  ;;  %1191 = vst [vmem:[%s1847_s15 + $0x320] sm:$0xff] %v1011_v5  ;;  %v1013_v7 = vpop.f32.mrb[33].mxu1 }
 0x170   : > { %1124 = vst.msk [vmem:[%s1847_s15 + $0x108] sm:$0xff] %vm1091_vm1, %v843_v6  ;;  %v845_v8 = vpop.f32.mrb[34].mxu0  ;;  %1192 = vst.msk [vmem:[%s1847_s15 + $0x328] sm:$0xff] %vm1091_vm1, %v1013_v7  ;;  %v1015_v9 = vpop.f32.mrb[34].mxu1 }
 0x171   : > { %1125 = vst [vmem:[%s1847_s15 + $0x110] sm:$0xff] %v845_v8  ;;  %v847_v10 = vpop.f32.mrb[35].mxu0  ;;  %1193 = vst [vmem:[%s1847_s15 + $0x330] sm:$0xff] %v1015_v9  ;;  %v1017_v11 = vpop.f32.mrb[35].mxu1 }
 0x172   : > { %1126 = vst.msk [vmem:[%s1847_s15 + $0x118] sm:$0xff] %vm1091_vm1, %v847_v10  ;;  %1194 = vst.msk [vmem:[%s1847_s15 + $0x338] sm:$0xff] %vm1091_vm1, %v1017_v11 }
 0x176   : > { %v851_v12 = vpop.f32.mrb[36].mxu0  ;;  %v1021_v13 = vpop.f32.mrb[36].mxu1 }
 0x177   : > { %1127 = vst [vmem:[%s1847_s15 + $0x120] sm:$0xff] %v851_v12  ;;  %v853_v14 = vpop.f32.mrb[37].mxu0  ;;  %1195 = vst [vmem:[%s1847_s15 + $0x340] sm:$0xff] %v1021_v13  ;;  %v1023_v15 = vpop.f32.mrb[37].mxu1 }
 0x178   : > { %1128 = vst.msk [vmem:[%s1847_s15 + $0x128] sm:$0xff] %vm1091_vm1, %v853_v14  ;;  %v855_v16 = vpop.f32.mrb[38].mxu0  ;;  %1196 = vst.msk [vmem:[%s1847_s15 + $0x348] sm:$0xff] %vm1091_vm1, %v1023_v15  ;;  %v1025_v17 = vpop.f32.mrb[38].mxu1 }
 0x179   : > { %1129 = vst [vmem:[%s1847_s15 + $0x130] sm:$0xff] %v855_v16  ;;  %v857_v18 = vpop.f32.mrb[39].mxu0  ;;  %1197 = vst [vmem:[%s1847_s15 + $0x350] sm:$0xff] %v1025_v17  ;;  %v1027_v19 = vpop.f32.mrb[39].mxu1 }
 0x17a   : > { %1130 = vst.msk [vmem:[%s1847_s15 + $0x138] sm:$0xff] %vm1091_vm1, %v857_v18  ;;  %1198 = vst.msk [vmem:[%s1847_s15 + $0x358] sm:$0xff] %vm1091_vm1, %v1027_v19 }
 0x17e   : > { %v861_v20 = vpop.f32.mrb[40].mxu0  ;;  %v1031_v21 = vpop.f32.mrb[40].mxu1 }
 0x17f   : > { %1131 = vst [vmem:[%s1847_s15 + $0x140] sm:$0xff] %v861_v20  ;;  %v863_v22 = vpop.f32.mrb[41].mxu0  ;;  %1199 = vst [vmem:[%s1847_s15 + $0x360] sm:$0xff] %v1031_v21  ;;  %v1033_v23 = vpop.f32.mrb[41].mxu1 }
 0x180   : > { %1132 = vst.msk [vmem:[%s1847_s15 + $0x148] sm:$0xff] %vm1091_vm1, %v863_v22  ;;  %v865_v24 = vpop.f32.mrb[42].mxu0  ;;  %1200 = vst.msk [vmem:[%s1847_s15 + $0x368] sm:$0xff] %vm1091_vm1, %v1033_v23  ;;  %v1035_v25 = vpop.f32.mrb[42].mxu1 }
 0x181   : > { %1133 = vst [vmem:[%s1847_s15 + $0x150] sm:$0xff] %v865_v24  ;;  %v867_v26 = vpop.f32.mrb[43].mxu0  ;;  %1201 = vst [vmem:[%s1847_s15 + $0x370] sm:$0xff] %v1035_v25  ;;  %v1037_v27 = vpop.f32.mrb[43].mxu1 }
 0x182   : > { %1134 = vst.msk [vmem:[%s1847_s15 + $0x158] sm:$0xff] %vm1091_vm1, %v867_v26  ;;  %1202 = vst.msk [vmem:[%s1847_s15 + $0x378] sm:$0xff] %vm1091_vm1, %v1037_v27 }
 0x186   : > { %v871_v28 = vpop.f32.mrb[44].mxu0  ;;  %v1041_v29 = vpop.f32.mrb[44].mxu1 }
 0x187   : > { %1135 = vst [vmem:[%s1847_s15 + $0x160] sm:$0xff] %v871_v28  ;;  %v873_v30 = vpop.f32.mrb[45].mxu0  ;;  %1203 = vst [vmem:[%s1847_s15 + $0x380] sm:$0xff] %v1041_v29  ;;  %v1043_v31 = vpop.f32.mrb[45].mxu1 }
 0x188   : > { %1136 = vst.msk [vmem:[%s1847_s15 + $0x168] sm:$0xff] %vm1091_vm1, %v873_v30  ;;  %v875_v32 = vpop.f32.mrb[46].mxu0  ;;  %1204 = vst.msk [vmem:[%s1847_s15 + $0x388] sm:$0xff] %vm1091_vm1, %v1043_v31  ;;  %v1045_v33 = vpop.f32.mrb[46].mxu1 }
 0x189   : > { %1137 = vst [vmem:[%s1847_s15 + $0x170] sm:$0xff] %v875_v32  ;;  %v877_v34 = vpop.f32.mrb[47].mxu0  ;;  %1205 = vst [vmem:[%s1847_s15 + $0x390] sm:$0xff] %v1045_v33  ;;  %v1047_v35 = vpop.f32.mrb[47].mxu1 }
 0x18a   : > { %1138 = vst.msk [vmem:[%s1847_s15 + $0x178] sm:$0xff] %vm1091_vm1, %v877_v34  ;;  %1206 = vst.msk [vmem:[%s1847_s15 + $0x398] sm:$0xff] %vm1091_vm1, %v1047_v35 }
 0x18e   : > { %v881_v36 = vpop.f32.mrb[48].mxu0  ;;  %v1051_v37 = vpop.f32.mrb[48].mxu1 }
 0x18f   : > { %1139 = vst [vmem:[%s1847_s15 + $0x180] sm:$0xff] %v881_v36  ;;  %v883_v38 = vpop.f32.mrb[49].mxu0  ;;  %1207 = vst [vmem:[%s1847_s15 + $0x3a0] sm:$0xff] %v1051_v37  ;;  %v1053_v39 = vpop.f32.mrb[49].mxu1 }
 0x190   : > { %1140 = vst.msk [vmem:[%s1847_s15 + $0x188] sm:$0xff] %vm1091_vm1, %v883_v38  ;;  %v885_v40 = vpop.f32.mrb[50].mxu0  ;;  %1208 = vst.msk [vmem:[%s1847_s15 + $0x3a8] sm:$0xff] %vm1091_vm1, %v1053_v39  ;;  %v1055_v41 = vpop.f32.mrb[50].mxu1 }
 0x191   : > { %1141 = vst [vmem:[%s1847_s15 + $0x190] sm:$0xff] %v885_v40  ;;  %v887_v42 = vpop.f32.mrb[51].mxu0  ;;  %1209 = vst [vmem:[%s1847_s15 + $0x3b0] sm:$0xff] %v1055_v41  ;;  %v1057_v43 = vpop.f32.mrb[51].mxu1 }
 0x192   : > { %1142 = vst.msk [vmem:[%s1847_s15 + $0x198] sm:$0xff] %vm1091_vm1, %v887_v42  ;;  %1210 = vst.msk [vmem:[%s1847_s15 + $0x3b8] sm:$0xff] %vm1091_vm1, %v1057_v43 }
 0x196   : > { %v891_v44 = vpop.f32.mrb[52].mxu0  ;;  %v1061_v45 = vpop.f32.mrb[52].mxu1 }
 0x197   : > { %1143 = vst [vmem:[%s1847_s15 + $0x1a0] sm:$0xff] %v891_v44  ;;  %v893_v46 = vpop.f32.mrb[53].mxu0  ;;  %1211 = vst [vmem:[%s1847_s15 + $0x3c0] sm:$0xff] %v1061_v45  ;;  %v1063_v47 = vpop.f32.mrb[53].mxu1 }
 0x198   : > { %1144 = vst.msk [vmem:[%s1847_s15 + $0x1a8] sm:$0xff] %vm1091_vm1, %v893_v46  ;;  %v895_v48 = vpop.f32.mrb[54].mxu0  ;;  %1212 = vst.msk [vmem:[%s1847_s15 + $0x3c8] sm:$0xff] %vm1091_vm1, %v1063_v47  ;;  %v1065_v49 = vpop.f32.mrb[54].mxu1 }
 0x199   : > { %1145 = vst [vmem:[%s1847_s15 + $0x1b0] sm:$0xff] %v895_v48  ;;  %v897_v50 = vpop.f32.mrb[55].mxu0  ;;  %1213 = vst [vmem:[%s1847_s15 + $0x3d0] sm:$0xff] %v1065_v49  ;;  %v1067_v51 = vpop.f32.mrb[55].mxu1 }
 0x19a   : > { %1146 = vst.msk [vmem:[%s1847_s15 + $0x1b8] sm:$0xff] %vm1091_vm1, %v897_v50  ;;  %1214 = vst.msk [vmem:[%s1847_s15 + $0x3d8] sm:$0xff] %vm1091_vm1, %v1067_v51 }
 0x19e   : > { %v901_v52 = vpop.f32.mrb[56].mxu0  ;;  %v1071_v53 = vpop.f32.mrb[56].mxu1 }
 0x19f   : > { %1147 = vst [vmem:[%s1847_s15 + $0x1c0] sm:$0xff] %v901_v52  ;;  %v903_v54 = vpop.f32.mrb[57].mxu0  ;;  %1215 = vst [vmem:[%s1847_s15 + $0x3e0] sm:$0xff] %v1071_v53  ;;  %v1073_v55 = vpop.f32.mrb[57].mxu1 }
 0x1a0   : > { %1148 = vst.msk [vmem:[%s1847_s15 + $0x1c8] sm:$0xff] %vm1091_vm1, %v903_v54  ;;  %v905_v56 = vpop.f32.mrb[58].mxu0  ;;  %1216 = vst.msk [vmem:[%s1847_s15 + $0x3e8] sm:$0xff] %vm1091_vm1, %v1073_v55  ;;  %v1075_v57 = vpop.f32.mrb[58].mxu1 }
 0x1a1   : > { %1149 = vst [vmem:[%s1847_s15 + $0x1d0] sm:$0xff] %v905_v56  ;;  %v907_v58 = vpop.f32.mrb[59].mxu0  ;;  %1217 = vst [vmem:[%s1847_s15 + $0x3f0] sm:$0xff] %v1075_v57  ;;  %v1077_v59 = vpop.f32.mrb[59].mxu1 }
 0x1a2   : > { %1150 = vst.msk [vmem:[%s1847_s15 + $0x1d8] sm:$0xff] %vm1091_vm1, %v907_v58  ;;  %1218 = vst.msk [vmem:[%s1847_s15 + $0x3f8] sm:$0xff] %vm1091_vm1, %v1077_v59 }
 0x1a6   : > { %v911_v60 = vpop.f32.mrb[60].mxu0  ;;  %v1081_v61 = vpop.f32.mrb[60].mxu1 }
 0x1a7   : > { %1151 = vst [vmem:[%s1847_s15 + $0x1e0] sm:$0xff] %v911_v60  ;;  %v913_v62 = vpop.f32.mrb[61].mxu0  ;;  %1219 = vst [vmem:[%s1847_s15 + $0x400] sm:$0xff] %v1081_v61  ;;  %v1083_v63 = vpop.f32.mrb[61].mxu1 }
 0x1a8   : > { %1152 = vst.msk [vmem:[%s1847_s15 + $0x1e8] sm:$0xff] %vm1091_vm1, %v913_v62  ;;  %v915_v0 = vpop.f32.mrb[62].mxu0  ;;  %1220 = vst.msk [vmem:[%s1847_s15 + $0x408] sm:$0xff] %vm1091_vm1, %v1083_v63  ;;  %v1085_v1 = vpop.f32.mrb[62].mxu1 }
 0x1a9   : > { %1153 = vst [vmem:[%s1847_s15 + $0x1f0] sm:$0xff] %v915_v0  ;;  %v917_v2 = vpop.f32.mrb[63].mxu0  ;;  %1221 = vst [vmem:[%s1847_s15 + $0x410] sm:$0xff] %v1085_v1  ;;  %v1087_v3 = vpop.f32.mrb[63].mxu1 }
 0x1aa   : > { %1154 = vst.msk [vmem:[%s1847_s15 + $0x1f8] sm:$0xff] %vm1091_vm1, %v917_v2  ;;  %1222 = vst.msk [vmem:[%s1847_s15 + $0x418] sm:$0xff] %vm1091_vm1, %v1087_v3 }
 0x1ae   : > { %v921_v4 = vpop.f32.mrb[64].mxu0 }
 0x1af   : > { %1155 = vst [vmem:[%s1847_s15 + $0x200] sm:$0xff] %v921_v4  ;;  %v923_v5 = vpop.f32.mrb[65].mxu0 }
 0x1b0   : > { %1156 = vst.msk [vmem:[%s1847_s15 + $0x208] sm:$0xff] %vm1091_vm1, %v923_v5  ;;  %v925_v6 = vpop.f32.mrb[66].mxu0 }
 0x1b1   : > { %1157 = vst [vmem:[%s1847_s15 + $0x210] sm:$0xff] %v925_v6  ;;  %v927_v7 = vpop.f32.mrb[67].mxu0 }
 0x1b2   : > { %1158 = vst.msk [vmem:[%s1847_s15 + $0x218] sm:$0xff] %vm1091_vm1, %v927_v7 }
 0x1b3 PF: > { %s13_s11 = sadd.s32 1, %s1650_s11   ;;  %s2068_s9 = smov %s1646_s10 }
 0x1b4   : > { %p10_p4 = scmp.ge.s32.totalorder %s13_s11, 4   ;;  %s2069_s10 = smov %s2071_s13 }
 0x1b6   :  { %12 = sbr.rel (!%p10_p4) target bundleno = 2 (0x2), region = 64 }
 0x1bd   :  { %1255 = vsyncpa [#allocation3], 1 }
 0x1be   :  { %1257 = vsyncpa [#allocation3 + $0x1], 1 }

</bundles_post_ra>
